<compile_context>
chip_gen: v5e
topology: v5e:2x2
jax: 0.10.0
libtpu: 0.0.40
codegen_flags: <defaults>
</compile_context>

<pallas_src>
import functools

import jax
import jax.numpy as jnp
from jax.experimental import pallas as pl
from jax.experimental.pallas import tpu as pltpu


def classifier_kernel(h_ref, w1_ref, b1_ref, w2_ref, b2_ref, out_ref, *, act_dtype):
    # h_ref:  (TB, D_in) f32/bf16   w1_ref: (D_in, H) bf16   b1_ref: (1, H) f32
    # w2_ref: (H, L) bf16           b2_ref: (1, L)  f32      out_ref: (TB, L) f32
    h = h_ref[...].astype(jnp.bfloat16)                       # VPU cast (free slot)
    pre = jnp.dot(h, w1_ref[...],
                  preferred_element_type=jnp.float32)         # MXU, f32 acc
    act = jnp.tanh((pre + b1_ref[...]).astype(act_dtype))     # EUP (bf16 on v6e/v7x)
    logits = jnp.dot(act.astype(jnp.bfloat16), w2_ref[...],
                     preferred_element_type=jnp.float32)      # MXU, f32 acc
    out_ref[...] = (logits + b2_ref[...]).astype(out_ref.dtype)


def _bf16_act_supported():
    """bf16 VPU/EUP exists on v6e and later; keep f32 activations on v5e/older."""
    try:
        kind = jax.devices()[0].device_kind.lower()
    except Exception:
        return False
    return any(tag in kind for tag in ("v6", "v7", "tpu7"))


def _pick_batch_tile(batch, d_in, h, l, in_itemsize, block_b=None):
    """VMEM-aware batch tile, multiple of 16, >= ~4 grid steps for big batches."""
    MIN_TB = 128                       # amortize ~0.35us per-step pipeline overhead
    MAX_TB = 8192
    VMEM_BUDGET = 24 * 1024 * 1024     # headroom under 32 MiB scoped limit (v7x-safe)
    MIN_STEPS = 4                      # let v7x's two TensorCores split the batch axis

    if block_b is not None:
        tb = max(16, (int(block_b) // 16) * 16)
        return batch if batch <= tb else tb

    if batch <= MIN_TB:
        return batch                   # single full-extent block (always legal)

    # Per-row VMEM bytes: double-buffered hidden tile + in-kernel bf16 copy
    # + f32 pre-activation (+ bf16 copy) + double-buffered f32 output rows.
    bytes_per_row = 2 * d_in * in_itemsize + 2 * d_in + 6 * h + 8 * l + 64
    vmem_cap = max(16, (VMEM_BUDGET // bytes_per_row) // 16 * 16)

    target = -(-batch // MIN_STEPS)    # cdiv: aim for >= MIN_STEPS grid steps
    target = -(-target // 16) * 16     # round up to bf16 sublane multiple
    tb = max(MIN_TB, target)
    tb = min(tb, vmem_cap, MAX_TB)
    return tb


def classifier_forward(hidden, w1, b1, w2, b2, *, block_b=None):
    """hidden: (B, D_in) float32 or bfloat16. Weights stored as (in, out).

    Returns logits (B, num_labels) in float32.
    """
    B, D_in = hidden.shape
    H = w1.shape[1]
    L = w2.shape[1]
    assert w1.shape == (D_in, H)
    assert w2.shape == (H, L)

    # Tiny weight/bias casts (would be stored bf16 offline in production).
    w1_bf16 = w1.astype(jnp.bfloat16)
    w2_bf16 = w2.astype(jnp.bfloat16)
    b1_f32 = b1.astype(jnp.float32).reshape(1, H)
    b2_f32 = b2.astype(jnp.float32).reshape(1, L)

    act_dtype = jnp.bfloat16 if _bf16_act_supported() else jnp.float32

    tb = _pick_batch_tile(B, D_in, H, L, hidden.dtype.itemsize, block_b)
    grid = (pl.cdiv(B, tb),)

    cost = pl.CostEstimate(
        flops=2 * B * (D_in * H + H * L),
        transcendentals=B * H,
        bytes_accessed=(hidden.dtype.itemsize * B * D_in
                        + 2 * (D_in * H + H * L)
                        + 4 * (H + L)
                        + 4 * B * L),
    )

    kernel = functools.partial(classifier_kernel, act_dtype=act_dtype)

    return pl.pallas_call(
        kernel,
        out_shape=jax.ShapeDtypeStruct((B, L), jnp.float32),
        grid_spec=pltpu.PrefetchScalarGridSpec(
            num_scalar_prefetch=0,
            grid=grid,
            in_specs=[
                pl.BlockSpec((tb, D_in), lambda i: (i, 0)),   # hidden: tiled over batch
                pl.BlockSpec((D_in, H), lambda i: (0, 0)),    # weights stay VMEM-resident
                pl.BlockSpec((1, H), lambda i: (0, 0)),
                pl.BlockSpec((H, L), lambda i: (0, 0)),
                pl.BlockSpec((1, L), lambda i: (0, 0)),
            ],
            out_specs=pl.BlockSpec((tb, L), lambda i: (i, 0)),
        ),
        compiler_params=pltpu.CompilerParams(
            # Batch axis is independent -> shard across both TCs on v7x.
            dimension_semantics=("parallel",),
            vmem_limit_bytes=32 * 1024 * 1024,
        ),
        cost_estimate=cost,
    )(hidden, w1_bf16, b1_f32, w2_bf16, b2_f32)


def init_params(key, input_dim, pre_classifier_dim, num_labels):
    """Deterministic init mimicking nn.Linear's U(-1/sqrt(fan_in), 1/sqrt(fan_in)).

    Weights are stored as (in, out) -- already transposed relative to PyTorch.
    """
    k1, k2, k3, k4 = jax.random.split(key, 4)
    bound1 = 1.0 / jnp.sqrt(input_dim)
    bound2 = 1.0 / jnp.sqrt(pre_classifier_dim)
    w1 = jax.random.uniform(k1, (input_dim, pre_classifier_dim),
                            jnp.float32, -bound1, bound1)
    b1 = jax.random.uniform(k2, (1, pre_classifier_dim),
                            jnp.float32, -bound1, bound1)
    w2 = jax.random.uniform(k3, (pre_classifier_dim, num_labels),
                            jnp.float32, -bound2, bound2)
    b2 = jax.random.uniform(k4, (1, num_labels),
                            jnp.float32, -bound2, bound2)
    return w1, b1, w2, b2


def _reference(hidden, w1, b1, w2, b2, act_dtype):
    """Plain-JAX reference using the same bf16-operand / f32-accumulate math."""
    h = hidden.astype(jnp.bfloat16)
    pre = jnp.dot(h, w1.astype(jnp.bfloat16), preferred_element_type=jnp.float32)
    act = jnp.tanh((pre + b1.reshape(1, -1)).astype(act_dtype))
    logits = jnp.dot(act.astype(jnp.bfloat16), w2.astype(jnp.bfloat16),
                     preferred_element_type=jnp.float32)
    return logits + b2.reshape(1, -1)


if __name__ == "__main__":
    # Small shapes consistent with the module's forward.
    batch = 8
    input_dim = 32
    pre_classifier_dim = 64
    num_labels = 4

    key = jax.random.PRNGKey(0)
    k_in, k_par = jax.random.split(key)

    hidden = jax.random.normal(k_in, (batch, input_dim), dtype=jnp.float32)
    w1, b1, w2, b2 = init_params(k_par, input_dim, pre_classifier_dim, num_labels)

    act_dtype = jnp.bfloat16 if _bf16_act_supported() else jnp.float32

    logits = classifier_forward(hidden, w1, b1, w2, b2)
    logits = jax.block_until_ready(logits)
    assert logits.shape == (batch, num_labels)
    assert bool(jnp.all(jnp.isfinite(logits)))

    # Same-arithmetic reference (bf16 operands / f32 accumulate / matching tanh dtype).
    ref = _reference(hidden, w1, b1, w2, b2, act_dtype)
    assert jnp.allclose(logits, ref, atol=2e-2, rtol=2e-2), "mismatch vs reference"

    # Sanity-check against the full-f32 PyTorch-equivalent math (loose tol for
    # bf16 operand/activation rounding).
    ref_f32 = jnp.tanh(hidden @ w1 + b1) @ w2 + b2
    assert jnp.allclose(logits, ref_f32, atol=5e-2, rtol=5e-2)

    # Exercise the multi-step, ragged-last-block path (no padding copy anymore).
    big_b = 1100  # not a multiple of the chosen tile -> masked partial block
    hidden_big = jax.random.normal(jax.random.PRNGKey(1), (big_b, input_dim),
                                   dtype=jnp.float32)
    logits_big = jax.block_until_ready(
        classifier_forward(hidden_big, w1, b1, w2, b2))
    ref_big = _reference(hidden_big, w1, b1, w2, b2, act_dtype)
    assert logits_big.shape == (big_b, num_labels)
    assert bool(jnp.all(jnp.isfinite(logits_big)))
    assert jnp.allclose(logits_big, ref_big, atol=2e-2, rtol=2e-2)

    print("KERNEL_OK")
</pallas_src>

<mosaic_0001>
module attributes {stable_mosaic.version = 11 : i64} {
  func.func @classifier_kernel(%arg0: i32, %arg1: memref<8x32xf32, #tpu.memory_space<vmem>>, %arg2: memref<32x64xbf16, #tpu.memory_space<vmem>>, %arg3: memref<1x64xf32, #tpu.memory_space<vmem>>, %arg4: memref<64x4xbf16, #tpu.memory_space<vmem>>, %arg5: memref<1x4xf32, #tpu.memory_space<vmem>>, %arg6: memref<8x4xf32, #tpu.memory_space<vmem>>) attributes {dimension_semantics = [#tpu.dimension_semantics<parallel>], iteration_bounds = array<i64: 1>, scalar_prefetch = 0 : i64, scratch_operands = 0 : i64, tpu.core_type = #tpu.core_type<tc>, window_params = [{transform_indices = @transform_0, window_bounds = array<i64: 8, 32>}, {pipeline_mode = #tpu.pipeline_mode<synchronous>, transform_indices = @transform_1, window_bounds = array<i64: 32, 64>}, {pipeline_mode = #tpu.pipeline_mode<synchronous>, transform_indices = @transform_2, window_bounds = array<i64: 1, 64>}, {pipeline_mode = #tpu.pipeline_mode<synchronous>, transform_indices = @transform_3, window_bounds = array<i64: 64, 4>}, {pipeline_mode = #tpu.pipeline_mode<synchronous>, transform_indices = @transform_4, window_bounds = array<i64: 1, 4>}, {transform_indices = @transform_5, window_bounds = array<i64: 8, 4>}]} {
    %c0 = arith.constant 0 : index
    %c0_0 = arith.constant 0 : index
    %0 = vector.load %arg1[%c0, %c0_0] : memref<8x32xf32, #tpu.memory_space<vmem>>, vector<8x32xf32>
    %1 = arith.truncf %0 : vector<8x32xf32> to vector<8x32xbf16>
    %c0_1 = arith.constant 0 : index
    %c0_2 = arith.constant 0 : index
    %2 = vector.load %arg2[%c0_1, %c0_2] : memref<32x64xbf16, #tpu.memory_space<vmem>>, vector<32x64xbf16>
    %cst = arith.constant dense<0.000000e+00> : vector<8x64xf32>
    %3 = tpu.matmul %1, %2, %cst {dimension_numbers = #tpu.dot_dimension_numbers<[1], [0], [0], [1], [0, 0, 1, 1], [], []>} : vector<8x32xbf16>, vector<32x64xbf16>, vector<8x64xf32> -> vector<8x64xf32>
    %c0_3 = arith.constant 0 : index
    %c0_4 = arith.constant 0 : index
    %4 = vector.load %arg3[%c0_3, %c0_4] : memref<1x64xf32, #tpu.memory_space<vmem>>, vector<1x64xf32>
    %5 = vector.broadcast %4 : vector<1x64xf32> to vector<8x64xf32>
    %6 = arith.addf %3, %5 : vector<8x64xf32>
    %7 = math.tanh %6 : vector<8x64xf32>
    %8 = arith.truncf %7 : vector<8x64xf32> to vector<8x64xbf16>
    %c0_5 = arith.constant 0 : index
    %c0_6 = arith.constant 0 : index
    %9 = vector.load %arg4[%c0_5, %c0_6] : memref<64x4xbf16, #tpu.memory_space<vmem>>, vector<64x4xbf16>
    %cst_7 = arith.constant dense<0.000000e+00> : vector<8x4xf32>
    %10 = tpu.matmul %8, %9, %cst_7 {dimension_numbers = #tpu.dot_dimension_numbers<[1], [0], [0], [1], [0, 0, 1, 1], [], []>} : vector<8x64xbf16>, vector<64x4xbf16>, vector<8x4xf32> -> vector<8x4xf32>
    %c0_8 = arith.constant 0 : index
    %c0_9 = arith.constant 0 : index
    %11 = vector.load %arg5[%c0_8, %c0_9] : memref<1x4xf32, #tpu.memory_space<vmem>>, vector<1x4xf32>
    %12 = vector.broadcast %11 : vector<1x4xf32> to vector<8x4xf32>
    %13 = arith.addf %10, %12 : vector<8x4xf32>
    %c0_10 = arith.constant 0 : index
    %c0_11 = arith.constant 0 : index
    %14 = vector.load %arg6[%c0_10, %c0_11] : memref<8x4xf32, #tpu.memory_space<vmem>>, vector<8x4xf32>
    tpu.vector_store %arg6[%c0_10, %c0_11], %13 {strides = array<i32>} : memref<8x4xf32, #tpu.memory_space<vmem>>, vector<8x4xf32>,
    return
  }
  func.func @transform_0(%arg0: i32) -> (i32, i32) {
    %c0_i32 = arith.constant 0 : i32
    %c0_i32_0 = arith.constant 0 : i32
    return %arg0, %c0_i32 : i32, i32
  }
  func.func @transform_1(%arg0: i32) -> (i32, i32) {
    %c0_i32 = arith.constant 0 : i32
    %c0_i32_0 = arith.constant 0 : i32
    %c0_i32_1 = arith.constant 0 : i32
    return %c0_i32, %c0_i32_0 : i32, i32
  }
  func.func @transform_2(%arg0: i32) -> (i32, i32) {
    %c0_i32 = arith.constant 0 : i32
    %c0_i32_0 = arith.constant 0 : i32
    %c0_i32_1 = arith.constant 0 : i32
    return %c0_i32, %c0_i32_0 : i32, i32
  }
  func.func @transform_3(%arg0: i32) -> (i32, i32) {
    %c0_i32 = arith.constant 0 : i32
    %c0_i32_0 = arith.constant 0 : i32
    %c0_i32_1 = arith.constant 0 : i32
    return %c0_i32, %c0_i32_0 : i32, i32
  }
  func.func @transform_4(%arg0: i32) -> (i32, i32) {
    %c0_i32 = arith.constant 0 : i32
    %c0_i32_0 = arith.constant 0 : i32
    %c0_i32_1 = arith.constant 0 : i32
    return %c0_i32, %c0_i32_0 : i32, i32
  }
  func.func @transform_5(%arg0: i32) -> (i32, i32) {
    %c0_i32 = arith.constant 0 : i32
    %c0_i32_0 = arith.constant 0 : i32
    return %arg0, %c0_i32 : i32, i32
  }
}

</mosaic_0001>

<bundles_post_ra>
// kernel: tpu_custom_call.1
= control target key start
LH: loop header
LB: loop body
LE: loop exit
PB: predicated region body
PF: predicated region fallthrough
CT: control target
= control target key end

     0   :  { %vm43_vm0 = vcmask 261120   ;;  %vm98_vm1 = vcmask 523264   ;;  %vm115_vm2 = vcmask 31744   ;;  %s217_s1 = inlined_call_operand.vmem [shape: bf16[32,64], index: 1, kind: input, shape index: {}]   ;;  %s218_s0 = inlined_call_operand.vmem [shape: f32[8,32], index: 0, kind: input, shape index: {}]   ;;  %s219_s3 = inlined_call_operand.vmem [shape: bf16[64,4], index: 3, kind: input, shape index: {}]   ;;  %s220_s2 = inlined_call_operand.vmem [shape: f32[1,64], index: 2, kind: input, shape index: {}]   ;;  %s221_s4 = inlined_call_operand.vmem [shape: f32[1,4], index: 4, kind: input, shape index: {}]   ;;  %s222_s5 = inlined_call_operand.vmem [shape: f32[8,4], index: 5, kind: output, shape index: {}]  }
   0x1   :  { %v148_v0 = vld [vmem:[%s217_s1 + $0x8] sm:$0xff]  ;;  %v152_v1 = vld [vmem:[%s219_s3 + $0x18] sm:$0xff]  ;;  %v147_v2 = vld [vmem:[%s217_s1] sm:$0xff] }
   0x2   :  { %53 = vmatpush.bf16.msra.mxu0 %v148_v0  ;;  %v21_v3 = vld [vmem:[%s218_s0] sm:$0xff]  ;;  %106 = vmatpush.bf16.msra.mxu1 %v152_v1  ;;  %v151_v5 = vld [vmem:[%s219_s3 + $0x10] sm:$0xff]  ;;  %v150_v6 = vld [vmem:[%s219_s3 + $0x8] sm:$0xff] }
   0x3   :  { %v22_v4 = vpack.c.bf16 %v21_v3, %v21_v3  ;;  %v149_v7 = vld [vmem:[%s219_s3] sm:$0xff] }
   0x4   :  { %v153_v8 = vld [vmem:[%s220_s2] ss:$0 sm:$0xff] }
   0x5   :  { %v154_v14 = vld [vmem:[%s221_s4] ss:$0 sm:$0xff] }
   0x6   :  { %54 = vmatpush.bf16.msra.mxu0 %v147_v2  ;;  %107 = vmatpush.bf16.msra.mxu1 %v151_v5 }
   0x9   :  { %129 = vmatmul.msk.bf16.vlgmr.msra.gmra.mxu0 %vm43_vm0, %v22_v4 }
   0xa   :  { %108 = vmatpush.bf16.msra.mxu1 %v150_v6 }
   0xe   :  { %109 = vmatpush.bf16.msra.mxu1 %v149_v7 }
  0x86   :  { %v56_v9 = vpop.f32.mrf.mxu0 }
  0x87   :  { %v57_v10 = vadd.f32 %v153_v8, %v56_v9 }
  0x89   :  { %155 = vtanh.f32 %v57_v10 }
  0x8e   :  { %v58_v11 = vpop.f32.mrf.mxu0 }
  0x8f   :  { %v156_v12 = vpop.eup %155 }
  0x90   :  { %v61_v13 = vpack.c.bf16 %v156_v12, %v156_v12 }
  0x92   :  { %146 = vmatmul.msk.bf16.vlgmr.msra.gmra.mxu1 %vm98_vm1, %v61_v13 }
 0x10f   :  { %v111_v15 = vpop.f32.mrf.mxu1 }
 0x110   :  { %v112_v16 = vadd.f32 %v154_v14, %v111_v15 }
 0x112   :  { %116 = vst.msk [vmem:[%s222_s5] sm:$0xff] %vm115_vm2, %v112_v16 }
 0x117   :  { %v113_v17 = vpop.f32.mrf.mxu1 }

</bundles_post_ra>
